<compile_context>
chip_gen: v7x
topology: tpu7x:2x2x1
jax: 0.10.0
libtpu: 0.0.40
codegen_flags: <defaults>
</compile_context>

<pallas_src>
import functools
import math

import jax
import jax.numpy as jnp
from jax.experimental import pallas as pl
from jax.experimental.pallas import tpu as pltpu

_VMEM_LIMIT = 64 * 1024 * 1024  # <= physical VMEM on v5e/v6e/v7x


def _round_up(x, m):
    return ((x + m - 1) // m) * m


def _pad_rows(x, mult):
    """Pad the leading (row) dim of a 2-D array up to a multiple of `mult`."""
    M = x.shape[0]
    pad = (-M) % mult
    if pad:
        x = jnp.pad(x, ((0, pad), (0, 0)))
    return x


def _row_tile(M, tmax=256):
    """Row tile: large (MXU friendly), multiple of 8, no bigger than padded M."""
    return min(tmax, _round_up(M, 8))


# ----------------------------- Pallas kernels -----------------------------

def _linear_kernel(x_ref, w_ref, b_ref, o_ref):
    acc = jnp.dot(x_ref[...], w_ref[...], preferred_element_type=jnp.float32)
    o_ref[...] = (acc + b_ref[...]).astype(o_ref.dtype)


def linear(x, w, b, tmax=256):
    """out = x @ w + b, row-tiled, rows auto-padded to the tile."""
    M, K = x.shape
    N = w.shape[1]
    tm = _row_tile(M, tmax)
    xp = _pad_rows(x, tm)
    Mp = xp.shape[0]
    out = pl.pallas_call(
        _linear_kernel,
        out_shape=jax.ShapeDtypeStruct((Mp, N), x.dtype),
        grid=(Mp // tm,),
        in_specs=[pl.BlockSpec((tm, K), lambda i: (i, 0)),
                  pl.BlockSpec((K, N), lambda i: (0, 0)),
                  pl.BlockSpec((1, N), lambda i: (0, 0))],
        out_specs=pl.BlockSpec((tm, N), lambda i: (i, 0)),
        compiler_params=pltpu.CompilerParams(
            dimension_semantics=("parallel",), vmem_limit_bytes=_VMEM_LIMIT),
    )(xp, w, b.reshape(1, N))
    return out[:M]


def _ln_mask_kernel(x_ref, m_ref, g_ref, b_ref, o_ref, *, eps):
    x = x_ref[...]
    mean = jnp.mean(x, axis=-1, keepdims=True)
    var = jnp.mean(jnp.square(x - mean), axis=-1, keepdims=True)
    y = (x - mean) * jax.lax.rsqrt(var + eps)
    o_ref[...] = ((y * g_ref[...] + b_ref[...]) * m_ref[...]).astype(o_ref.dtype)


def layer_norm_mask(x, mask_col, gamma, beta, eps, tmax=256):
    """out = LayerNorm(x) * mask_col   (embedding norm; no zeros residual)."""
    M, D = x.shape
    tm = _row_tile(M, tmax)
    xp = _pad_rows(x, tm)
    mp = _pad_rows(mask_col, tm)
    Mp = xp.shape[0]
    kern = functools.partial(_ln_mask_kernel, eps=eps)
    out = pl.pallas_call(
        kern,
        out_shape=jax.ShapeDtypeStruct((Mp, D), x.dtype),
        grid=(Mp // tm,),
        in_specs=[pl.BlockSpec((tm, D), lambda i: (i, 0)),
                  pl.BlockSpec((tm, 1), lambda i: (i, 0)),
                  pl.BlockSpec((1, D), lambda i: (0, 0)),
                  pl.BlockSpec((1, D), lambda i: (0, 0))],
        out_specs=pl.BlockSpec((tm, D), lambda i: (i, 0)),
        compiler_params=pltpu.CompilerParams(
            dimension_semantics=("parallel",), vmem_limit_bytes=_VMEM_LIMIT),
    )(xp, mp, gamma.reshape(1, D), beta.reshape(1, D))
    return out[:M]


def _proj_add_ln_kernel(x_ref, w_ref, b_ref, res_ref, g_ref, bt_ref, o_ref, *, eps):
    y = jnp.dot(x_ref[...], w_ref[...], preferred_element_type=jnp.float32)
    y = y + b_ref[...] + res_ref[...]
    mean = jnp.mean(y, axis=-1, keepdims=True)
    var = jnp.mean(jnp.square(y - mean), axis=-1, keepdims=True)
    y = (y - mean) * jax.lax.rsqrt(var + eps)
    o_ref[...] = (y * g_ref[...] + bt_ref[...]).astype(o_ref.dtype)


def proj_add_layer_norm(x, w, b, res, gamma, beta, eps, tmax=256):
    """out = LayerNorm(x @ w + b + res)  (fused out-proj + residual + LN)."""
    M, K = x.shape
    N = w.shape[1]
    tm = _row_tile(M, tmax)
    xp = _pad_rows(x, tm)
    rp = _pad_rows(res, tm)
    Mp = xp.shape[0]
    kern = functools.partial(_proj_add_ln_kernel, eps=eps)
    out = pl.pallas_call(
        kern,
        out_shape=jax.ShapeDtypeStruct((Mp, N), x.dtype),
        grid=(Mp // tm,),
        in_specs=[pl.BlockSpec((tm, K), lambda i: (i, 0)),
                  pl.BlockSpec((K, N), lambda i: (0, 0)),
                  pl.BlockSpec((1, N), lambda i: (0, 0)),
                  pl.BlockSpec((tm, N), lambda i: (i, 0)),
                  pl.BlockSpec((1, N), lambda i: (0, 0)),
                  pl.BlockSpec((1, N), lambda i: (0, 0))],
        out_specs=pl.BlockSpec((tm, N), lambda i: (i, 0)),
        compiler_params=pltpu.CompilerParams(
            dimension_semantics=("parallel",), vmem_limit_bytes=_VMEM_LIMIT),
    )(xp, w, b.reshape(1, N), rp, gamma.reshape(1, N), beta.reshape(1, N))
    return out[:M]


def _ffn_add_ln_kernel(x_ref, w1_ref, b1_ref, w2_ref, b2_ref, g_ref, bt_ref,
                       o_ref, acc_ref, *, eps):
    fi = pl.program_id(1)

    @pl.when(fi == 0)
    def _init():
        acc_ref[...] = jnp.zeros_like(acc_ref)

    h = jnp.dot(x_ref[...], w1_ref[...], preferred_element_type=jnp.float32) + b1_ref[...]
    h = jax.nn.gelu(h, approximate=False)  # nn.GELU default (erf form)
    acc_ref[...] += jnp.dot(h, w2_ref[...], preferred_element_type=jnp.float32)

    @pl.when(fi == pl.num_programs(1) - 1)
    def _finalize():
        y = acc_ref[...] + b2_ref[...] + x_ref[...]          # residual = FFN input
        mean = jnp.mean(y, axis=-1, keepdims=True)
        var = jnp.mean(jnp.square(y - mean), axis=-1, keepdims=True)
        y = (y - mean) * jax.lax.rsqrt(var + eps)
        o_ref[...] = (y * g_ref[...] + bt_ref[...]).astype(o_ref.dtype)


def ffn_add_layer_norm(x, w1, b1, w2, b2, gamma, beta, eps, tmax=256, tf_max=512):
    """out = LayerNorm(GELU(x@w1+b1)@w2 + b2 + x), tiled over the FFN hidden dim."""
    M, K = x.shape
    F = w1.shape[1]
    N = w2.shape[1]
    tm = _row_tile(M, tmax)
    tf = tf_max if F % tf_max == 0 else F   # fall back to full F if it doesn't tile
    xp = _pad_rows(x, tm)
    Mp = xp.shape[0]
    kern = functools.partial(_ffn_add_ln_kernel, eps=eps)
    out = pl.pallas_call(
        kern,
        out_shape=jax.ShapeDtypeStruct((Mp, N), x.dtype),
        grid=(Mp // tm, F // tf),
        in_specs=[pl.BlockSpec((tm, K), lambda i, f: (i, 0)),
                  pl.BlockSpec((K, tf), lambda i, f: (0, f)),
                  pl.BlockSpec((1, tf), lambda i, f: (0, f)),
                  pl.BlockSpec((tf, N), lambda i, f: (f, 0)),
                  pl.BlockSpec((1, N), lambda i, f: (0, 0)),
                  pl.BlockSpec((1, N), lambda i, f: (0, 0)),
                  pl.BlockSpec((1, N), lambda i, f: (0, 0))],
        out_specs=pl.BlockSpec((tm, N), lambda i, f: (i, 0)),
        scratch_shapes=[pltpu.VMEM((tm, N), jnp.float32)],
        compiler_params=pltpu.CompilerParams(
            dimension_semantics=("parallel", "arbitrary"),
            vmem_limit_bytes=_VMEM_LIMIT),
    )(xp, w1, b1.reshape(1, F), w2, b2.reshape(1, N),
      gamma.reshape(1, N), beta.reshape(1, N))
    return out[:M]


def _disentangled_attn_kernel(qkv_ref, rel_ref, mask_ref, o_ref, *,
                              n_heads, head_dim, span, scale):
    S = qkv_ref.shape[1]
    dim = n_heads * head_dim
    qkv = qkv_ref[0]                # [S, 3*dim]  (packed q|k|v columns)
    rel = rel_ref[...]              # [2*span, 3*dim] (packed rel@wq | rel@wk | rel@wv)
    key_mask = mask_ref[0, 0]       # [S]  1.0 = keep, 0.0 = pad
    neg = jnp.finfo(jnp.float32).min
    add_mask = (1.0 - key_mask) * neg            # [S], broadcast over query rows

    # relative-position selection built in-kernel (no [S,S,2span] HBM traffic)
    qi = jax.lax.broadcasted_iota(jnp.int32, (S, S), 0)
    kj = jax.lax.broadcasted_iota(jnp.int32, (S, S), 1)
    idx = jnp.clip(qi - kj + span, 0, 2 * span - 1)                     # [S,S]
    m_iota = jax.lax.broadcasted_iota(jnp.int32, (S, S, 2 * span), 2)
    onehot = (m_iota == idx[:, :, None]).astype(jnp.float32)            # [S,S,2span]

    nt = (((1,), (1,)), ((), ()))   # contract last dims (x @ y^T)
    ctx_heads = []
    for h in range(n_heads):        # static unroll over heads (compile-time int)
        lo = h * head_dim
        hi = lo + head_dim
        q = qkv[:, lo:hi]                       # [S, hd]
        k = qkv[:, dim + lo:dim + hi]           # [S, hd]
        v = qkv[:, 2 * dim + lo:2 * dim + hi]   # [S, hd]
        pq = rel[:, lo:hi]                      # [2span, hd] positional queries
        pk = rel[:, dim + lo:dim + hi]          # [2span, hd] positional keys

        c2c = jax.lax.dot_general(q, k, nt, preferred_element_type=jnp.float32)        # [S,S]
        c2p_full = jax.lax.dot_general(q, pk, nt, preferred_element_type=jnp.float32)  # [S,2span]
        p2c_full = jax.lax.dot_general(k, pq, nt, preferred_element_type=jnp.float32)  # [S,2span]

        # gather along the relative-position axis (== torch.gather in reference)
        c2p = jnp.sum(c2p_full[:, None, :] * onehot, axis=-1)   # [S,S]
        p2c = jnp.sum(p2c_full[None, :, :] * onehot, axis=-1)   # [S,S]

        scores = (c2c + c2p + p2c) * scale + add_mask[None, :]
        m = jnp.max(scores, axis=-1, keepdims=True)
        e = jnp.exp(scores - m)
        denom = jnp.sum(e, axis=-1, keepdims=True)
        probs = e * pl.reciprocal(denom, approx=True)            # EUP, frees VALU
        ctx_heads.append(jnp.dot(probs, v, preferred_element_type=jnp.float32))

    # single lane-dense [S, dim] store, already in [B, S, dim] layout
    o_ref[0] = jnp.concatenate(ctx_heads, axis=-1).astype(o_ref.dtype)


def disentangled_attention(qkv, rel_qkv, key_mask, *, n_heads, head_dim, span, scale):
    B, S, three_dim = qkv.shape
    dim = n_heads * head_dim
    span2 = rel_qkv.shape[0]
    kern = functools.partial(_disentangled_attn_kernel, n_heads=n_heads,
                             head_dim=head_dim, span=span, scale=scale)
    return pl.pallas_call(
        kern,
        out_shape=jax.ShapeDtypeStruct((B, S, dim), qkv.dtype),
        grid=(B,),
        in_specs=[pl.BlockSpec((1, S, three_dim), lambda b: (b, 0, 0)),
                  pl.BlockSpec((span2, three_dim), lambda b: (0, 0)),
                  pl.BlockSpec((1, 1, S), lambda b: (b, 0, 0))],
        out_specs=pl.BlockSpec((1, S, dim), lambda b: (b, 0, 0)),
        compiler_params=pltpu.CompilerParams(
            dimension_semantics=("parallel",), vmem_limit_bytes=_VMEM_LIMIT),
    )(qkv, rel_qkv, key_mask)


# -------------------------- parameters (synthetic) --------------------------

def init_params(key, *, vocab_size, pinyin_vocab_size, dim, dim_ff, n_segments,
                n_layers, max_relative_positions, initializer_range=0.02):
    keys = iter(jax.random.split(key, 8 + 8 * n_layers))

    def normal(shape):
        return jax.random.normal(next(keys), shape, jnp.float32) * initializer_range

    params = {
        "tok_emb": normal((vocab_size, dim)),
        "pinyin_emb": normal((pinyin_vocab_size, dim)),
        "seg_emb": normal((n_segments, dim)),
        "emb_ln_g": jnp.ones((dim,), jnp.float32),
        "emb_ln_b": jnp.zeros((dim,), jnp.float32),
        "rel_emb": normal((2 * max_relative_positions, dim)),
        "layers": [],
    }
    for _ in range(n_layers):
        params["layers"].append({
            "wq": normal((dim, dim)), "bq": jnp.zeros((dim,), jnp.float32),
            "wk": normal((dim, dim)), "bk": jnp.zeros((dim,), jnp.float32),
            "wv": normal((dim, dim)), "bv": jnp.zeros((dim,), jnp.float32),
            "wo": normal((dim, dim)), "bo": jnp.zeros((dim,), jnp.float32),
            "ln1_g": jnp.ones((dim,), jnp.float32), "ln1_b": jnp.zeros((dim,), jnp.float32),
            "w1": normal((dim, dim_ff)), "b1": jnp.zeros((dim_ff,), jnp.float32),
            "w2": normal((dim_ff, dim)), "b2": jnp.zeros((dim,), jnp.float32),
            "ln2_g": jnp.ones((dim,), jnp.float32), "ln2_b": jnp.zeros((dim,), jnp.float32),
        })
    return params


# ------------------------------ model forward ------------------------------

def deberta_bare_pinyin_forward(params, input_ids, token_type_ids, pinyin_ids,
                                attention_mask=None, *, n_heads,
                                max_relative_positions, layer_norm_eps=1e-12,
                                padding_index=0):
    B, S = input_ids.shape
    dim = params["tok_emb"].shape[1]
    hd = dim // n_heads
    f32 = jnp.float32

    if attention_mask is None:
        attention_mask = (input_ids != padding_index).astype(f32)
    else:
        attention_mask = attention_mask.astype(f32)

    # ---- BertEmbeddingPinyin (gathers are glue; LN*mask is a Pallas kernel) ----
    emb = (params["tok_emb"][input_ids]
           + params["pinyin_emb"][pinyin_ids]
           + params["seg_emb"][token_type_ids]).astype(f32)
    emb2d = layer_norm_mask(emb.reshape(B * S, dim),
                            attention_mask.reshape(B * S, 1),
                            params["emb_ln_g"], params["emb_ln_b"], layer_norm_eps)
    embedding_output = emb2d.reshape(B, S, dim)

    # key padding mask, [B, 1, S]; additive form is built inside the attention kernel
    key_mask = attention_mask.reshape(B, 1, S)

    # relative positions; position_buckets = 0 -> plain (q - k)
    span = max_relative_positions
    ids = jnp.arange(S)
    relative_pos = (ids[:, None] - ids[None, :])[None].astype(jnp.int32)   # [1, S, S]

    scale = 1.0 / math.sqrt(hd * 3)  # scale_factor = 1 + |{c2p, p2c}| = 3
    rel = params["rel_emb"]          # [2*span, dim]

    hidden = embedding_output
    all_hidden_states = [hidden]

    for L in params["layers"]:
        x2d = hidden.reshape(B * S, dim)

        # fused QKV projection: pack [wq|wk|wv] and fold the relative-embedding
        # rows into the same matmul (share_att_key=True: pos_q/pos_k reuse wq/wk).
        w_qkv = jnp.concatenate([L["wq"], L["wk"], L["wv"]], axis=1)   # [dim, 3dim]
        b_qkv = jnp.concatenate([L["bq"], L["bk"], L["bv"]], axis=0)   # [3dim]
        xin = jnp.concatenate([x2d, rel], axis=0)                      # [B*S + 2span, dim]
        qkv_all = linear(xin, w_qkv, b_qkv)                            # [B*S + 2span, 3dim]
        qkv_c = qkv_all[:B * S].reshape(B, S, 3 * dim)
        rel_qkv = qkv_all[B * S:B * S + 2 * span]                      # [2span, 3dim]

        # disentangled attention; output comes back already in [B, S, dim] layout
        ctx = disentangled_attention(qkv_c, rel_qkv, key_mask,
                                     n_heads=n_heads, head_dim=hd,
                                     span=span, scale=scale)

        # fused: output projection + residual + LayerNorm
        h2d = proj_add_layer_norm(ctx.reshape(B * S, dim), L["wo"], L["bo"],
                                  x2d, L["ln1_g"], L["ln1_b"], layer_norm_eps)

        # fused: GELU FFN + residual + LayerNorm (F-tiled with VMEM accumulator)
        h2d = ffn_add_layer_norm(h2d, L["w1"], L["b1"], L["w2"], L["b2"],
                                 L["ln2_g"], L["ln2_b"], layer_norm_eps)

        hidden = h2d.reshape(B, S, dim)
        all_hidden_states.append(hidden)

    return {
        "sequence_output": hidden,
        "pooled_output": None,          # output_pooled=False
        "relative_pos": relative_pos,
        "mask": attention_mask,
        "embedding": embedding_output,
        "hidden": all_hidden_states,
        "attention": None,
    }


# ----------------------- pure-JAX reference (for check) -----------------------

def _ln_ref(x, g, b, eps):
    mu = x.mean(-1, keepdims=True)
    var = ((x - mu) ** 2).mean(-1, keepdims=True)
    return (x - mu) / jnp.sqrt(var + eps) * g + b


def reference_forward(params, input_ids, token_type_ids, pinyin_ids, *, n_heads,
                      max_relative_positions, layer_norm_eps=1e-12, padding_index=0):
    B, S = input_ids.shape
    dim = params["tok_emb"].shape[1]
    hd = dim // n_heads
    f32 = jnp.float32
    mask = (input_ids != padding_index).astype(f32)

    emb = (params["tok_emb"][input_ids] + params["pinyin_emb"][pinyin_ids]
           + params["seg_emb"][token_type_ids]).astype(f32)
    emb = _ln_ref(emb, params["emb_ln_g"], params["emb_ln_b"], layer_norm_eps)
    emb = emb * mask[:, :, None]

    neg = jnp.finfo(f32).min
    amask = jnp.broadcast_to(((1.0 - mask) * neg)[:, None, None, :], (B, 1, S, S))

    span = max_relative_positions
    ids = jnp.arange(S)
    rel_pos = ids[:, None] - ids[None, :]
    c2p_idx = jnp.clip(rel_pos + span, 0, 2 * span - 1)
    p2c_idx = jnp.clip(-rel_pos + span, 0, 2 * span - 1)
    scale = 1.0 / math.sqrt(hd * 3)

    hidden = emb
    rel = params["rel_emb"]
    for L in params["layers"]:
        q = (hidden @ L["wq"] + L["bq"]).reshape(B, S, n_heads, hd).transpose(0, 2, 1, 3)
        k = (hidden @ L["wk"] + L["bk"]).reshape(B, S, n_heads, hd).transpose(0, 2, 1, 3)
        v = (hidden @ L["wv"] + L["bv"]).reshape(B, S, n_heads, hd).transpose(0, 2, 1, 3)
        pos_k = (rel @ L["wk"] + L["bk"]).reshape(2 * span, n_heads, hd).transpose(1, 0, 2)
        pos_q = (rel @ L["wq"] + L["bq"]).reshape(2 * span, n_heads, hd).transpose(1, 0, 2)

        c2c = jnp.einsum("bhqd,bhkd->bhqk", q, k)
        c2p_full = jnp.einsum("bhqd,hmd->bhqm", q, pos_k)
        c2p = jnp.take_along_axis(
            c2p_full, jnp.broadcast_to(c2p_idx[None, None], (B, n_heads, S, S)), axis=-1)
        p2c_full = jnp.einsum("bhkd,hmd->bhkm", k, pos_q)
        p2c = jnp.take_along_axis(
            p2c_full, jnp.broadcast_to(p2c_idx[None, None], (B, n_heads, S, S)), axis=-1)
        p2c = jnp.swapaxes(p2c, -1, -2)

        scores = (c2c + c2p + p2c) * scale + amask
        probs = jax.nn.softmax(scores, axis=-1)
        ctx = jnp.einsum("bhqk,bhkd->bhqd", probs, v).transpose(0, 2, 1, 3).reshape(B, S, dim)
        attn_out = ctx @ L["wo"] + L["bo"]
        h = _ln_ref(attn_out + hidden, L["ln1_g"], L["ln1_b"], layer_norm_eps)
        ff = jax.nn.gelu(h @ L["w1"] + L["b1"], approximate=False) @ L["w2"] + L["b2"]
        hidden = _ln_ref(ff + h, L["ln2_g"], L["ln2_b"], layer_norm_eps)
    return hidden


# ----------------------------------- main -----------------------------------

if __name__ == "__main__":
    B, S = 2, 8
    dim, dim_ff = 32, 64
    n_heads, n_layers = 4, 2
    vocab_size, pinyin_vocab_size, n_segments = 100, 50, 2
    max_relative_positions = 8   # position_buckets = 0

    key = jax.random.PRNGKey(0)
    pkey, ikey, ykey = jax.random.split(key, 3)
    params = init_params(pkey, vocab_size=vocab_size,
                         pinyin_vocab_size=pinyin_vocab_size, dim=dim, dim_ff=dim_ff,
                         n_segments=n_segments, n_layers=n_layers,
                         max_relative_positions=max_relative_positions)

    input_ids = jax.random.randint(ikey, (B, S), 1, vocab_size, dtype=jnp.int32)
    input_ids = input_ids.at[1, -2:].set(0)   # some padding (padding_index = 0)
    pinyin_ids = jax.random.randint(ykey, (B, S), 1, pinyin_vocab_size, dtype=jnp.int32)
    token_type_ids = jnp.zeros((B, S), jnp.int32)

    out = deberta_bare_pinyin_forward(
        params, input_ids, token_type_ids, pinyin_ids,
        n_heads=n_heads, max_relative_positions=max_relative_positions)
    seq = jax.block_until_ready(out["sequence_output"])

    ref = reference_forward(
        params, input_ids, token_type_ids, pinyin_ids,
        n_heads=n_heads, max_relative_positions=max_relative_positions)
    # tolerance slightly looser than f32 exact because the softmax denominator
    # uses the EUP approximate reciprocal (pl.reciprocal(approx=True)).
    if not jnp.allclose(seq, ref, atol=2e-3, rtol=2e-3):
        raise AssertionError("Pallas output diverges from pure-JAX reference")

    print("KERNEL_OK")
</pallas_src>

<mosaic_0001>
module attributes {stable_mosaic.version = 11 : i64} {
  func.func @_ln_mask_kernel(%arg0: i32, %arg1: memref<16x32xf32, #tpu.memory_space<vmem>>, %arg2: memref<16x1xf32, #tpu.memory_space<vmem>>, %arg3: memref<1x32xf32, #tpu.memory_space<vmem>>, %arg4: memref<1x32xf32, #tpu.memory_space<vmem>>, %arg5: memref<16x32xf32, #tpu.memory_space<vmem>>) attributes {dimension_semantics = [#tpu.dimension_semantics<parallel>], iteration_bounds = array<i64: 1>, scalar_prefetch = 0 : i64, scratch_operands = 0 : i64, tpu.core_type = #tpu.core_type<tc>, window_params = [{transform_indices = @transform_0, window_bounds = array<i64: 16, 32>}, {transform_indices = @transform_1, window_bounds = array<i64: 16, 1>}, {pipeline_mode = #tpu.pipeline_mode<synchronous>, transform_indices = @transform_2, window_bounds = array<i64: 1, 32>}, {pipeline_mode = #tpu.pipeline_mode<synchronous>, transform_indices = @transform_3, window_bounds = array<i64: 1, 32>}, {transform_indices = @transform_4, window_bounds = array<i64: 16, 32>}]} {
    %c0 = arith.constant 0 : index
    %c0_0 = arith.constant 0 : index
    %0 = vector.load %arg1[%c0, %c0_0] : memref<16x32xf32, #tpu.memory_space<vmem>>, vector<16x32xf32>
    %cst = arith.constant dense<0.000000e+00> : vector<16xf32>
    %1 = vector.multi_reduction <add>, %0, %cst [1] : vector<16x32xf32> to vector<16xf32>
    %2 = vector.shape_cast %1 : vector<16xf32> to vector<16x1xf32>
    %cst_1 = arith.constant 3.200000e+01 : f32
    %3 = vector.broadcast %cst_1 : f32 to vector<16x1xf32>
    %4 = arith.divf %2, %3 : vector<16x1xf32>
    %5 = vector.broadcast %4 : vector<16x1xf32> to vector<16x32xf32>
    %6 = arith.subf %0, %5 : vector<16x32xf32>
    %7 = arith.mulf %6, %6 : vector<16x32xf32>
    %cst_2 = arith.constant dense<0.000000e+00> : vector<16xf32>
    %8 = vector.multi_reduction <add>, %7, %cst_2 [1] : vector<16x32xf32> to vector<16xf32>
    %9 = vector.shape_cast %8 : vector<16xf32> to vector<16x1xf32>
    %cst_3 = arith.constant 3.200000e+01 : f32
    %10 = vector.broadcast %cst_3 : f32 to vector<16x1xf32>
    %11 = arith.divf %9, %10 : vector<16x1xf32>
    %12 = vector.broadcast %4 : vector<16x1xf32> to vector<16x32xf32>
    %13 = arith.subf %0, %12 : vector<16x32xf32>
    %cst_4 = arith.constant 9.99999996E-13 : f32
    %14 = vector.broadcast %cst_4 : f32 to vector<16x1xf32>
    %15 = arith.addf %11, %14 : vector<16x1xf32>
    %16 = math.rsqrt %15 : vector<16x1xf32>
    %17 = vector.broadcast %16 : vector<16x1xf32> to vector<16x32xf32>
    %18 = arith.mulf %13, %17 : vector<16x32xf32>
    %c0_5 = arith.constant 0 : index
    %c0_6 = arith.constant 0 : index
    %19 = vector.load %arg3[%c0_5, %c0_6] : memref<1x32xf32, #tpu.memory_space<vmem>>, vector<1x32xf32>
    %20 = vector.broadcast %19 : vector<1x32xf32> to vector<16x32xf32>
    %21 = arith.mulf %18, %20 : vector<16x32xf32>
    %c0_7 = arith.constant 0 : index
    %c0_8 = arith.constant 0 : index
    %22 = vector.load %arg4[%c0_7, %c0_8] : memref<1x32xf32, #tpu.memory_space<vmem>>, vector<1x32xf32>
    %23 = vector.broadcast %22 : vector<1x32xf32> to vector<16x32xf32>
    %24 = arith.addf %21, %23 : vector<16x32xf32>
    %c0_9 = arith.constant 0 : index
    %c0_10 = arith.constant 0 : index
    %25 = vector.load %arg2[%c0_9, %c0_10] : memref<16x1xf32, #tpu.memory_space<vmem>>, vector<16x1xf32>
    %26 = vector.broadcast %25 : vector<16x1xf32> to vector<16x32xf32>
    %27 = arith.mulf %24, %26 : vector<16x32xf32>
    %c0_11 = arith.constant 0 : index
    %c0_12 = arith.constant 0 : index
    %28 = vector.load %arg5[%c0_11, %c0_12] : memref<16x32xf32, #tpu.memory_space<vmem>>, vector<16x32xf32>
    tpu.vector_store %arg5[%c0_11, %c0_12], %27 {strides = array<i32>} : memref<16x32xf32, #tpu.memory_space<vmem>>, vector<16x32xf32>,
    return
  }
  func.func @transform_0(%arg0: i32) -> (i32, i32) {
    %c0_i32 = arith.constant 0 : i32
    %c0_i32_0 = arith.constant 0 : i32
    return %arg0, %c0_i32 : i32, i32
  }
  func.func @transform_1(%arg0: i32) -> (i32, i32) {
    %c0_i32 = arith.constant 0 : i32
    %c0_i32_0 = arith.constant 0 : i32
    return %arg0, %c0_i32 : i32, i32
  }
  func.func @transform_2(%arg0: i32) -> (i32, i32) {
    %c0_i32 = arith.constant 0 : i32
    %c0_i32_0 = arith.constant 0 : i32
    %c0_i32_1 = arith.constant 0 : i32
    return %c0_i32, %c0_i32_0 : i32, i32
  }
  func.func @transform_3(%arg0: i32) -> (i32, i32) {
    %c0_i32 = arith.constant 0 : i32
    %c0_i32_0 = arith.constant 0 : i32
    %c0_i32_1 = arith.constant 0 : i32
    return %c0_i32, %c0_i32_0 : i32, i32
  }
  func.func @transform_4(%arg0: i32) -> (i32, i32) {
    %c0_i32 = arith.constant 0 : i32
    %c0_i32_0 = arith.constant 0 : i32
    return %arg0, %c0_i32 : i32, i32
  }
}

</mosaic_0001>

<bundles_post_ra>
// kernel: tpu_custom_call.1
= control target key start
LH: loop header
LB: loop body
LE: loop exit
PB: predicated region body
PF: predicated region fallthrough
CT: control target
= control target key end

     0   :  { %9 = vsyncpa [#allocation3], 0  ;;  %s401_s0 = inlined_call_operand.hbm [shape: f32[16,32], index: 0, kind: input, shape index: {}]   ;;  %s402_s1 = inlined_call_operand.hbm [shape: f32[16,1], index: 1, kind: input, shape index: {}]   ;;  %s403_s2 = inlined_call_operand.hbm [shape: f32[1,32], index: 2, kind: input, shape index: {}]   ;;  %s404_s3 = inlined_call_operand.hbm [shape: f32[1,32], index: 3, kind: input, shape index: {}]   ;;  %s405_s4 = inlined_call_operand.hbm [shape: f32[16,32], index: 4, kind: output, shape index: {}]  }
   0x1   :  { %10 = vsyncpa [#allocation6], 0 }
   0x2   :  { %11 = vsyncpa [#allocation9], 0 }
   0x3   :  { %12 = vsyncpa [#allocation4], 0  ;;  %s286_s15 = smov [#allocation5]   ;;  %s287_s17 = smov [#allocation2]  }
   0x4   :  { %s30_s16 = sshll.u32 %s286_s15, 4  ;;  %s18_s18 = sshll.u32 %s287_s17, 4  ;;  %s31_s16 = int_to_ptr.vmem [resolvable:$true] %s30_s16  ;;  %s319_s18 = int_to_ptr.vmem [resolvable:$true] %s18_s18 }
   0x5   :  { %s168_s21 = scalar_lea.hbm %s402_s1, 256 }
   0x6   :  { %p169_p0 = scmp.ne.s32.totalorder %s402_s1, %s168_s21  ;;  %p172_p1 = scmp.lt.u32.totalorder %s168_s21, %s402_s1 }
   0x8   :  { %p174_p2 = pnand %p172_p1, %p169_p0 }
   0xa   :  { %177 = shalt.err (!%p174_p2)
}
   0xb   :  { %s178_s26 = scalar_lea.vmem %s31_s16, 256  ;;  %p183_p4 = scmp.lt.s32.totalorder %s31_s16, %s31_s16 }
   0xc   :  { %p179_p3 = scmp.ne.s32.totalorder %s31_s16, %s178_s26  ;;  %p184_p5 = scmp.lt.s32.totalorder %s178_s26, %s178_s26 }
   0xe   :  { %p185_p6 = por %p184_p5, %p183_p4 }
  0x10   :  { %p186_p7 = pnand %p185_p6, %p179_p3 }
  0x12   :  { %189 = shalt.err (!%p186_p7)
}
  0x13   :  { %s288_s27 = smov 128   ;;  %s289_s28 = smov 8  }
  0x14   :  { %36 = dma.hbm_to_vmem [thread:$0]  %s402_s1, 256, %s31_s16, [#allocation6], %s288_s27, %s288_s27, %s289_s28  }
  0x15   :  { %s190_s7 = scalar_lea.hbm %s401_s0, 256 }
  0x16   :  { %p191_p8 = scmp.ne.s32.totalorder %s401_s0, %s190_s7  ;;  %p194_p9 = scmp.lt.u32.totalorder %s190_s7, %s401_s0 }
  0x18   :  { %p196_p10 = pnand %p194_p9, %p191_p8 }
  0x1a   :  { %199 = shalt.err (!%p196_p10)
}
  0x1b   :  { %s200_s12 = scalar_lea.vmem %s319_s18, 256  ;;  %p205_p12 = scmp.lt.s32.totalorder %s319_s18, %s319_s18 }
  0x1c   :  { %p201_p11 = scmp.ne.s32.totalorder %s319_s18, %s200_s12  ;;  %p206_p13 = scmp.lt.s32.totalorder %s200_s12, %s200_s12 }
  0x1e   :  { %p207_p0 = por %p206_p13, %p205_p12 }
  0x20   :  { %p208_p1 = pnand %p207_p0, %p201_p11 }
  0x22   :  { %211 = shalt.err (!%p208_p1)
}
  0x23   :  { %24 = dma.hbm_to_vmem [thread:$0]  %s401_s0, 256, %s319_s18, [#allocation3], %s288_s27, %s288_s27, %s289_s28  }
  0x24   :  { %s290_s14 = smov [#allocation7]   ;;  %s291_s16 = smov [#allocation8]  }
  0x25   :  { %s43_s15 = sshll.u32 %s290_s14, 4  ;;  %s53_s17 = sshll.u32 %s291_s16, 4  ;;  %s44_s15 = int_to_ptr.vmem [resolvable:$true] %s43_s15  ;;  %s54_s17 = int_to_ptr.vmem [resolvable:$true] %s53_s17 }
  0x26   :  { %s212_s21 = scalar_lea.hbm %s403_s2, 16 }
  0x27   :  { %p213_p2 = scmp.ne.s32.totalorder %s403_s2, %s212_s21  ;;  %p216_p3 = scmp.lt.u32.totalorder %s212_s21, %s403_s2 }
  0x29   :  { %p218_p4 = pnand %p216_p3, %p213_p2 }
  0x2b   :  { %221 = shalt.err (!%p218_p4)
}
  0x2c   :  { %s222_s0 = scalar_lea.vmem %s44_s15, 16  ;;  %s226_s18 = scalar_lea.vmem %s44_s15, 32 }
  0x2d   :  { %p223_p5 = scmp.ne.s32.totalorder %s44_s15, %s222_s0  ;;  %p227_p6 = scmp.lt.s32.totalorder %s44_s15, %s44_s15 }
  0x2e   :  { %p228_p7 = scmp.lt.s32.totalorder %s226_s18, %s222_s0 }
  0x30   :  { %p229_p8 = por %p228_p7, %p227_p6 }
  0x32   :  { %p230_p9 = pnand %p229_p8, %p223_p5 }
  0x34   :  { %233 = shalt.err (!%p230_p9)
}
  0x35   :  { %46 = dma.hbm_to_vmem [thread:$0]  %s403_s2, 16, %s44_s15, [#allocation6]  }
  0x36   :  { %s234_s6 = scalar_lea.hbm %s404_s3, 16 }
  0x37   :  { %p235_p10 = scmp.ne.s32.totalorder %s404_s3, %s234_s6  ;;  %p238_p11 = scmp.lt.u32.totalorder %s234_s6, %s404_s3 }
  0x39   :  { %p240_p12 = pnand %p238_p11, %p235_p10 }
  0x3b   :  { %243 = shalt.err (!%p240_p12)
}
  0x3c   :  { %s244_s11 = scalar_lea.vmem %s54_s17, 16  ;;  %s248_s12 = scalar_lea.vmem %s54_s17, 32 }
  0x3d   :  { %p245_p13 = scmp.ne.s32.totalorder %s54_s17, %s244_s11  ;;  %p249_p0 = scmp.lt.s32.totalorder %s54_s17, %s54_s17 }
  0x3e   :  { %p250_p1 = scmp.lt.s32.totalorder %s248_s12, %s244_s11 }
  0x40   :  { %p251_p2 = por %p250_p1, %p249_p0 }
  0x42   :  { %p252_p3 = pnand %p251_p2, %p245_p13 }
  0x44   :  { %255 = shalt.err (!%p252_p3)
}
  0x45   :  { %56 = dma.hbm_to_vmem [thread:$0]  %s404_s3, 16, %s54_s17, [#allocation9]  }
  0x46   :  { %278 = dma.done.wait [#allocation3], 256  }
  0x47   :  { %279 = vsyncadd [#allocation3], 4294967040 }
  0x48   :  { %280 = dma.done.wait [#allocation6], 272  }
  0x49   :  { %281 = vsyncadd [#allocation6], 4294967024 }
  0x4a   :  { %282 = dma.done.wait [#allocation9], 16  }
  0x4b   :  { %283 = vsyncadd [#allocation9], 4294967280  ;;  %vm71_vm0 = vcmask 261120   ;;  %v69_v0 = vld [vmem:[#allocation2] sm:$0xff]  ;;  %v70_v1 = vld [vmem:[#allocation2 + $0x8] sm:$0xff]  ;;  %v292_v5 = vmov 0  }
  0x4c   :  { %v72_v2 = vsel %vm71_vm0, %v69_v0, 0.0  ;;  %v75_v3 = vsel %vm71_vm0, %v70_v1, 0.0  ;;  %v117_v4 = vld [vmem:[#allocation5] sm:$0xff]  ;;  %162 = vset.pattern.permute.xlu0 %v292_v5  ;;  %163 = vset.pattern.permute.xlu1 %v292_v5  ;;  %v118_v16 = vld [vmem:[#allocation5 + $0x8] sm:$0xff]  ;;  %v152_v24 = vld [vmem:[#allocation7] ss:$0 sm:$0xff] }
  0x4d   :  { %73 = vadd.xlane.f32.xlu0 %v72_v2  ;;  %v153_v26 = vld [vmem:[#allocation8] ss:$0 sm:$0xff]  ;;  %s293_s3 = smov [#allocation10]  }
  0x4e   :  { %s138_s13 = sshll.u32 %s293_s3, 4  ;;  %s139_s13 = int_to_ptr.vmem [resolvable:$true] %s138_s13 }
  0x4f   :  { %s256_s14 = scalar_lea.vmem %s139_s13, 256  ;;  %p261_p5 = scmp.lt.s32.totalorder %s139_s13, %s139_s13 }
  0x50   :  { %p257_p4 = scmp.ne.s32.totalorder %s139_s13, %s256_s14  ;;  %p262_p6 = scmp.lt.s32.totalorder %s256_s14, %s256_s14 }
  0x51   :  { %76 = vadd.xlane.f32.xlu0 %v75_v3 }
  0x52   :  { %p263_p7 = por %p262_p6, %p261_p5 }
  0x54   :  { %p264_p8 = pnand %p263_p7, %p257_p4 }
  0x67   :  { %121 = vperm.xlu0 %162, %v117_v4  }
  0xda   :  { %v74_v6 = vpop.xlane.xlu0 %73 }
  0xdb   :  { %v79_v7 = vmul.f32 0.03125, %v74_v6 }
  0xdd   :  { %v81_v8 = vsub.f32 %v69_v0, %v79_v7 }
  0xde   :  { %v77_v9 = vpop.xlane.xlu0 %76 }
  0xdf   :  { %v80_v10 = vmul.f32 0.03125, %v77_v9  ;;  %v83_v11 = vmul.f32 %v81_v8, %v81_v8 }
  0xe1   :  { %v82_v12 = vsub.f32 %v70_v1, %v80_v10  ;;  %v85_v13 = vsel %vm71_vm0, %v83_v11, 0.0 }
  0xe2   :  { %86 = vadd.xlane.f32.xlu1 %v85_v13 }
  0xe3   :  { %v84_v14 = vmul.f32 %v82_v12, %v82_v12 }
  0xe5   :  { %v88_v15 = vsel %vm71_vm0, %v84_v14, 0.0 }
  0xe6   :  { %89 = vadd.xlane.f32.xlu1 %v88_v15  ;;  %v122_v29 = vpop.permute.xlu0 %121 }
  0xf7   :  { %126 = vperm.xlu1 %163, %v118_v16  }
 0x16f   :  { %v87_v17 = vpop.xlane.xlu1 %86 }
 0x170   :  { %v91_v18 = vmul.f32 0.03125, %v87_v17 }
 0x172   :  { %v93_v19 = vadd.f32 1e-12, %v91_v18 }
 0x173   :  { %v90_v20 = vpop.xlane.xlu1 %89 }
 0x174   :  { %164 = vrsqrt.f32 %v93_v19  ;;  %v92_v21 = vmul.f32 0.03125, %v90_v20 }
 0x176   :  { %v94_v22 = vadd.f32 1e-12, %v92_v21 }
 0x177   :  { %v127_v34 = vpop.permute.xlu1 %126 }
 0x178   :  { %166 = vrsqrt.f32 %v94_v22 }
 0x17e   :  { %v165_v23 = vpop.eup %164 }
 0x17f   :  { %v97_v25 = vmul.f32 %v165_v23, %v81_v8 }
 0x181   :  { %v106_v27 = vmul.f32 %v152_v24, %v97_v25 }
 0x182   :  { %v167_v28 = vpop.eup %166 }
 0x183   :  { %v115_v30 = vadd.f32 %v153_v26, %v106_v27  ;;  %v98_v31 = vmul.f32 %v167_v28, %v82_v12 }
 0x185   :  { %v129_v32 = vmul.f32 %v122_v29, %v115_v30  ;;  %v107_v33 = vmul.f32 %v152_v24, %v98_v31 }
 0x187   :  { %131 = vst.msk [vmem:[#allocation10] sm:$0xff] %vm71_vm0, %v129_v32  ;;  %v116_v35 = vadd.f32 %v153_v26, %v107_v33 }
 0x189   :  { %v130_v36 = vmul.f32 %v127_v34, %v116_v35 }
 0x18b   :  { %132 = vst.msk [vmem:[#allocation10 + $0x8] sm:$0xff] %vm71_vm0, %v130_v36 }
 0x18c   :  { %267 = shalt.err (!%p264_p8)
}
 0x18d   :  { %s268_s17 = scalar_lea.hbm %s405_s4, 256 }
 0x18e   :  { %p269_p9 = scmp.ne.s32.totalorder %s405_s4, %s268_s17  ;;  %p272_p10 = scmp.lt.u32.totalorder %s268_s17, %s405_s4 }
 0x190   :  { %p274_p11 = pnand %p272_p10, %p269_p9 }
 0x192   :  { %277 = shalt.err (!%p274_p11)
}
 0x193   :  { %144 = dma.vmem_to_hbm [thread:$0]  %s139_s13, 256, %s405_s4, [#allocation4], %s288_s27, %s288_s27, %s289_s28  }
 0x194   :  { %284 = dma.done.wait [#allocation4], 256  }
 0x195   :  { %285 = vsyncadd [#allocation4], 4294967040 }
 0x196   :  { %148 = vsyncpa [#allocation3], 1 }
 0x197   :  { %149 = vsyncpa [#allocation6], 1 }
 0x198   :  { %150 = vsyncpa [#allocation9], 1 }
 0x199   :  { %151 = vsyncpa [#allocation4], 1 }

</bundles_post_ra>
